<compile_context>
chip_gen: v7x
topology: tpu7x:2x2x1
jax: 0.10.0
libtpu: 0.0.40
codegen_flags: <defaults>
</compile_context>

<pallas_src>
import math

import jax
import jax.numpy as jnp
from jax import lax
from jax.experimental import pallas as pl
from jax.experimental.pallas import tpu as pltpu


def _round_up(a, b):
    return (a + b - 1) // b * b


def _dist_linear_kernel(x_ref, v_ref, row_scale_ref, col_scale_ref, o_ref):
    # x_ref: (TM, indim)   v_ref: (TN, indim)
    # row_scale_ref: (TM, 1) f32   col_scale_ref: (1, TN) f32   o_ref: (TM, TN)
    cos = lax.dot_general(
        x_ref[...], v_ref[...],
        dimension_numbers=(((1,), (1,)), ((), ())),   # NT form: no transpose of either operand
        preferred_element_type=jnp.float32,
    )                                                 # (TM, TN) f32 accumulation on the MXU
    # Single fused epilogue pass over the output tile (important on v5e's 1 vst slot).
    o_ref[...] = (cos * row_scale_ref[...] * col_scale_ref[...]).astype(o_ref.dtype)


def _vmem_budget_bytes():
    try:
        cap = int(pltpu.get_tpu_info().vmem_capacity_bytes)
    except Exception:  # not on TPU / older jax: assume the smallest generation (v7x, 64 MiB)
        cap = 64 * 1024 * 1024
    # 75% of physical VMEM, capped at 100 MiB even on 128 MiB parts (v5e/v6e).
    return min(int(cap * 0.75), 100 * 1024 * 1024)


def _select_tiles(B, indim, n_pad, x_bytes, v_bytes, o_bytes, pack, budget,
                  max_block_m, max_block_n):
    nb = n_pad // 128
    # Largest 128-multiples that exactly divide the padded outdim (no extra weight padding).
    tn_cands = sorted(
        {d * 128 for d in range(1, nb + 1) if nb % d == 0 and d * 128 <= max(max_block_n, 128)},
        reverse=True)

    def usage(tm, tn):
        # double-buffered x / v / out tiles + (tiny) scale vectors, in bytes
        return 2 * (tm * indim * x_bytes + tn * indim * v_bytes
                    + tm * tn * o_bytes + (tm + tn) * 4)

    tm = min(_round_up(B, pack), _round_up(max_block_m, pack))
    while True:
        for tn in tn_cands:
            if usage(tm, tn) <= budget:
                return tm, tn, usage(tm, tn)
        if tm <= pack:
            tn = tn_cands[-1]
            return tm, tn, usage(tm, tn)
        tm = max(pack, _round_up(tm // 2, pack))


def dist_linear(x, weight_v, weight_g, *, compute_dtype=None,
                max_block_m=1024, max_block_n=2048):
    """scores = scale_factor * (x / (||x||+1e-5)) @ (g * v / ||v||).T

    x: (B, indim); weight_v: (outdim, indim); weight_g: (outdim,) or (outdim, 1).
    compute_dtype: optional operand dtype for the matmul (e.g. jnp.bfloat16) — cast once,
      outside the hot loop; accumulation/scales/output stay f32-accurate.
    """
    B, indim = x.shape
    outdim = weight_v.shape[0]
    out_dtype = x.dtype
    scale_factor = 2.0 if outdim <= 200 else 10.0     # static, baked into the hoisted scale

    # ---- hoisted scale vectors: computed ONCE per call (not once per grid step) ----
    xf = x.astype(jnp.float32)
    x_norm = jnp.sqrt(jnp.sum(xf * xf, axis=1, keepdims=True))              # (B, 1)
    row_scale = scale_factor / (x_norm + 1e-5)                              # exact reciprocal

    vf = weight_v.astype(jnp.float32)
    v_sq = jnp.sum(vf * vf, axis=1)                                         # (outdim,)
    col_scale = (weight_g.reshape(-1).astype(jnp.float32)
                 * lax.rsqrt(v_sq)).reshape(1, outdim)                      # lane-major (1, outdim)

    # ---- matmul operand dtype: cast once, outside the kernel ----
    if compute_dtype is not None:
        x = x.astype(compute_dtype)
        weight_v = weight_v.astype(compute_dtype)
    elif weight_v.dtype != x.dtype:
        weight_v = weight_v.astype(x.dtype)

    x_bytes = jnp.dtype(x.dtype).itemsize
    v_bytes = jnp.dtype(weight_v.dtype).itemsize
    o_bytes = jnp.dtype(out_dtype).itemsize
    pack = {1: 32, 2: 16}.get(x_bytes, 8)             # sublane packing for the batch-tile rows

    n_pad = _round_up(outdim, 128)                     # pad at most 127 columns (lane-dense out)
    budget = _vmem_budget_bytes()
    tm, tn, used = _select_tiles(B, indim, n_pad, x_bytes, v_bytes, o_bytes,
                                 pack, int(budget * 0.85), max_block_m, max_block_n)
    b_pad = _round_up(B, tm)

    if b_pad != B:
        x = jnp.pad(x, ((0, b_pad - B), (0, 0)))
        row_scale = jnp.pad(row_scale, ((0, b_pad - B), (0, 0)))
    if n_pad != outdim:
        weight_v = jnp.pad(weight_v, ((0, n_pad - outdim), (0, 0)))
        col_scale = jnp.pad(col_scale, ((0, 0), (0, n_pad - outdim)))

    grid = (b_pad // tm, n_pad // tn)
    vmem_limit = int(min(max(used + (4 << 20), 16 << 20), budget))

    out = pl.pallas_call(
        _dist_linear_kernel,
        out_shape=jax.ShapeDtypeStruct((b_pad, n_pad), out_dtype),
        grid=grid,
        in_specs=[
            pl.BlockSpec((tm, indim), lambda i, j: (i, 0)),    # x tile (feature dim kept whole)
            pl.BlockSpec((tn, indim), lambda i, j: (j, 0)),    # weight_v tile streamed over j
            pl.BlockSpec((tm, 1), lambda i, j: (i, 0)),        # hoisted per-row scale
            pl.BlockSpec((1, tn), lambda i, j: (0, j)),        # hoisted per-column scale
        ],
        out_specs=pl.BlockSpec((tm, tn), lambda i, j: (i, j)),
        compiler_params=pltpu.CompilerParams(
            # No scratch carry across the grid anymore -> both axes independent; on v7x the
            # large outdim axis can shard across both TensorCores even when B fits in one tile.
            dimension_semantics=("parallel", "parallel"),
            vmem_limit_bytes=vmem_limit,
        ),
    )(x, weight_v, row_scale, col_scale)

    return out[:B, :outdim]


def dist_linear_ref(x, weight_v, weight_g):
    outdim = weight_v.shape[0]
    scale_factor = 2.0 if outdim <= 200 else 10.0
    x_norm = jnp.linalg.norm(x, axis=1, keepdims=True)
    x_normalized = x / (x_norm + 1e-5)
    v_norm = jnp.linalg.norm(weight_v, axis=1, keepdims=True)
    w = weight_g.reshape(-1, 1) * weight_v / v_norm
    return scale_factor * (x_normalized @ w.T)


if __name__ == "__main__":
    key = jax.random.PRNGKey(0)
    B, indim = 16, 128

    # outdim=200: scale_factor=2 and a ragged (non-multiple-of-128) head -> exercises the pad path.
    # outdim=256: scale_factor=10 and an already lane-aligned head (no weight padding at all).
    for outdim in (200, 256):
        kx, kv = jax.random.split(jax.random.fold_in(key, outdim))
        x = jax.random.normal(kx, (B, indim), dtype=jnp.float32)

        # nn.Linear-style init; WeightNorm init: g = ||v||_2 per output row.
        bound = 1.0 / math.sqrt(indim)
        weight_v = jax.random.uniform(kv, (outdim, indim), dtype=jnp.float32,
                                      minval=-bound, maxval=bound)
        weight_g = jnp.linalg.norm(weight_v, axis=1, keepdims=True)

        out = jax.block_until_ready(dist_linear(x, weight_v, weight_g))
        ref = dist_linear_ref(x, weight_v, weight_g)
        assert out.shape == (B, outdim)
        assert jnp.allclose(out, ref, atol=2e-2, rtol=2e-2), f"mismatch vs reference (outdim={outdim})"

    print("KERNEL_OK")
</pallas_src>

<mosaic_0001>
module attributes {stable_mosaic.version = 11 : i64} {
  func.func @_dist_linear_kernel(%arg0: i32, %arg1: i32, %arg2: memref<16x128xf32, #tpu.memory_space<vmem>>, %arg3: memref<256x128xf32, #tpu.memory_space<vmem>>, %arg4: memref<16x1xf32, #tpu.memory_space<vmem>>, %arg5: memref<1x256xf32, #tpu.memory_space<vmem>>, %arg6: memref<16x256xf32, #tpu.memory_space<vmem>>) attributes {dimension_semantics = [#tpu.dimension_semantics<parallel>, #tpu.dimension_semantics<parallel>], iteration_bounds = array<i64: 1, 1>, scalar_prefetch = 0 : i64, scratch_operands = 0 : i64, tpu.core_type = #tpu.core_type<tc>, window_params = [{transform_indices = @transform_0, window_bounds = array<i64: 16, 128>}, {transform_indices = @transform_1, window_bounds = array<i64: 256, 128>}, {transform_indices = @transform_2, window_bounds = array<i64: 16, 1>}, {transform_indices = @transform_3, window_bounds = array<i64: 1, 256>}, {transform_indices = @transform_4, window_bounds = array<i64: 16, 256>}]} {
    %c0 = arith.constant 0 : index
    %c0_0 = arith.constant 0 : index
    %0 = vector.load %arg2[%c0, %c0_0] : memref<16x128xf32, #tpu.memory_space<vmem>>, vector<16x128xf32>
    %c0_1 = arith.constant 0 : index
    %c0_2 = arith.constant 0 : index
    %1 = vector.load %arg3[%c0_1, %c0_2] : memref<256x128xf32, #tpu.memory_space<vmem>>, vector<256x128xf32>
    %cst = arith.constant dense<0.000000e+00> : vector<16x256xf32>
    %2 = tpu.matmul %0, %1, %cst {dimension_numbers = #tpu.dot_dimension_numbers<[1], [1], [0], [0], [0, 0, 1, 0], [], []>} : vector<16x128xf32>, vector<256x128xf32>, vector<16x256xf32> -> vector<16x256xf32>
    %c0_3 = arith.constant 0 : index
    %c0_4 = arith.constant 0 : index
    %3 = vector.load %arg4[%c0_3, %c0_4] : memref<16x1xf32, #tpu.memory_space<vmem>>, vector<16x1xf32>
    %4 = vector.broadcast %3 : vector<16x1xf32> to vector<16x256xf32>
    %5 = arith.mulf %2, %4 : vector<16x256xf32>
    %c0_5 = arith.constant 0 : index
    %c0_6 = arith.constant 0 : index
    %6 = vector.load %arg5[%c0_5, %c0_6] : memref<1x256xf32, #tpu.memory_space<vmem>>, vector<1x256xf32>
    %7 = vector.broadcast %6 : vector<1x256xf32> to vector<16x256xf32>
    %8 = arith.mulf %5, %7 : vector<16x256xf32>
    %c0_7 = arith.constant 0 : index
    %c0_8 = arith.constant 0 : index
    %9 = vector.load %arg6[%c0_7, %c0_8] : memref<16x256xf32, #tpu.memory_space<vmem>>, vector<16x256xf32>
    tpu.vector_store %arg6[%c0_7, %c0_8], %8 {strides = array<i32>} : memref<16x256xf32, #tpu.memory_space<vmem>>, vector<16x256xf32>,
    return
  }
  func.func @transform_0(%arg0: i32, %arg1: i32) -> (i32, i32) {
    %c0_i32 = arith.constant 0 : i32
    %c0_i32_0 = arith.constant 0 : i32
    return %arg0, %c0_i32 : i32, i32
  }
  func.func @transform_1(%arg0: i32, %arg1: i32) -> (i32, i32) {
    %c0_i32 = arith.constant 0 : i32
    %c0_i32_0 = arith.constant 0 : i32
    return %arg1, %c0_i32 : i32, i32
  }
  func.func @transform_2(%arg0: i32, %arg1: i32) -> (i32, i32) {
    %c0_i32 = arith.constant 0 : i32
    %c0_i32_0 = arith.constant 0 : i32
    return %arg0, %c0_i32 : i32, i32
  }
  func.func @transform_3(%arg0: i32, %arg1: i32) -> (i32, i32) {
    %c0_i32 = arith.constant 0 : i32
    %c0_i32_0 = arith.constant 0 : i32
    return %c0_i32, %arg1 : i32, i32
  }
  func.func @transform_4(%arg0: i32, %arg1: i32) -> (i32, i32) {
    %c0_i32 = arith.constant 0 : i32
    return %arg0, %arg1 : i32, i32
  }
}

</mosaic_0001>

<bundles_post_ra>
// kernel: tpu_custom_call.1
= control target key start
LH: loop header
LB: loop body
LE: loop exit
PB: predicated region body
PF: predicated region fallthrough
CT: control target
= control target key end

     0   :  { %9 = vsyncpa [#allocation3], 0  ;;  %s415_s0 = inlined_call_operand.vmem [shape: f32[16,128], index: 0, kind: input, shape index: {}]   ;;  %s416_s1 = inlined_call_operand.hbm [shape: f32[256,128], index: 1, kind: input, shape index: {}]   ;;  %s417_s2 = inlined_call_operand.vmem [shape: f32[16,1], index: 2, kind: input, shape index: {}]   ;;  %s418_s3 = inlined_call_operand.vmem [shape: f32[1,256], index: 3, kind: input, shape index: {}]   ;;  %s419_s4 = inlined_call_operand.hbm [shape: f32[16,256], index: 4, kind: output, shape index: {}]  }
   0x1   :  { %10 = vsyncpa [#allocation4], 0  ;;  %s336_s15 = smov [#allocation2]   ;;  %s288_s19 = scalar_lea.hbm %s416_s1, 4096 }
   0x2   :  { %s18_s16 = sshll.u32 %s336_s15, 4  ;;  %p289_p0 = scmp.ne.s32.totalorder %s416_s1, %s288_s19  ;;  %s19_s16 = int_to_ptr.vmem [resolvable:$true] %s18_s16 }
   0x3   :  { %p292_p1 = scmp.lt.u32.totalorder %s288_s19, %s416_s1 }
   0x5   :  { %p294_p2 = pnand %p292_p1, %p289_p0 }
   0x7   :  { %297 = shalt.err (!%p294_p2)
}
   0x8   :  { %s298_s24 = scalar_lea.vmem %s19_s16, 4096  ;;  %p303_p4 = scmp.lt.s32.totalorder %s19_s16, %s19_s16 }
   0x9   :  { %p299_p3 = scmp.ne.s32.totalorder %s19_s16, %s298_s24  ;;  %p304_p5 = scmp.lt.s32.totalorder %s298_s24, %s298_s24 }
   0xb   :  { %p305_p6 = por %p304_p5, %p303_p4 }
   0xd   :  { %p306_p7 = pnand %p305_p6, %p299_p3 }
   0xf   :  { %309 = shalt.err (!%p306_p7)
}
  0x10   :  { %s337_s25 = smov 128   ;;  %s338_s26 = smov 8  }
  0x11   :  { %24 = dma.hbm_to_vmem [thread:$0]  %s416_s1, 4096, %s19_s16, [#allocation3], %s337_s25, %s337_s25, %s338_s26  }
  0x12   :  { %332 = dma.done.wait [#allocation3], 4096  }
  0x13   :  { %333 = vsyncadd [#allocation3], 4294963200  ;;  %v339_v0 = vmov 0   ;;  %v50_v1 = vld [vmem:[#allocation2 + $0x80] sm:$0xff]  ;;  %v51_v2 = vld [vmem:[#allocation2 + $0x88] sm:$0xff]  ;;  %v161_v53 = vlaneseq  ;;  %s340_s10 = smov [#allocation5]  }
  0x14   :  { %287 = vset.pattern.permute.xlu0 %v339_v0  ;;  %v34_v3 = vld [vmem:[#allocation2] sm:$0xff]  ;;  %v232_v4 = vpack.c.bf16 %v51_v2, %v50_v1  ;;  %v35_v5 = vld [vmem:[#allocation2 + $0x8] sm:$0xff]  ;;  %v52_v6 = vld [vmem:[#allocation2 + $0x90] sm:$0xff]  ;;  %s184_s11 = sshll.u32 %s340_s10, 4  ;;  %s185_s11 = int_to_ptr.vmem [resolvable:$true] %s184_s11 }
  0x15   :  { %v53_v7 = vld [vmem:[#allocation2 + $0x98] sm:$0xff]  ;;  %v234_v8 = vpack.c.bf16 %v35_v5, %v34_v3  ;;  %v36_v10 = vld [vmem:[#allocation2 + $0x10] sm:$0xff]  ;;  %v54_v12 = vld [vmem:[#allocation2 + $0xa0] sm:$0xff]  ;;  %v162_v54 = vshrl.u32 %v161_v53, 7  ;;  %p315_p9 = scmp.lt.s32.totalorder %s185_s11, %s185_s11 }
  0x16   :  { %v236_v9 = vpack.c.bf16 %v53_v7, %v52_v6  ;;  %233 = vmatprep.subr.bf16.mxu0 %v232_v4  ;;  %264 = vmatprep.subr.bf16.mxu1 %v232_v4  ;;  %v37_v11 = vld [vmem:[#allocation2 + $0x18] sm:$0xff]  ;;  %v55_v13 = vld [vmem:[#allocation2 + $0xa8] sm:$0xff]  ;;  %v383_v16 = vld [vmem:[%s415_s0] sm:$0xff] }
  0x17   :  { %235 = vmatpush3.bf16.xpose.msra.mxu0 %v234_v8  ;;  %272 = vmatpush3.bf16.xpose.msra.mxu1 %v234_v8  ;;  %v238_v14 = vpack.c.bf16 %v37_v11, %v36_v10  ;;  %v240_v15 = vpack.c.bf16 %v55_v13, %v54_v12  ;;  %v389_v17 = vld [vmem:[%s415_s0 + $0x8] sm:$0xff]  ;;  %v143_v18 = vld [vmem:[%s417_s2] sm:$0xff]  ;;  %v56_v21 = vld [vmem:[#allocation2 + $0xb0] sm:$0xff]  ;;  %v163_v56 = vsub.s32 0, %v162_v54  ;;  %v167_v58 = vsub.s32 1, %v162_v54 }
  0x18   :  { %237 = vmatprep.subr.bf16.mxu0 %v236_v9  ;;  %265 = vmatprep.subr.bf16.mxu1 %v236_v9  ;;  %v38_v19 = vld [vmem:[#allocation2 + $0x20] sm:$0xff]  ;;  %v39_v20 = vld [vmem:[#allocation2 + $0x28] sm:$0xff]  ;;  %v57_v22 = vld [vmem:[#allocation2 + $0xb8] sm:$0xff] }
  0x19   :  { %228 = vmatprep.mubr.f32.mxu0 %v383_v16  ;;  %230 = vmatprep.mubr.f32.mxu1 %v389_v17  ;;  %v144_v23 = vld [vmem:[%s417_s2 + $0x8] sm:$0xff]  ;;  %v242_v24 = vpack.c.bf16 %v39_v20, %v38_v19  ;;  %v244_v25 = vpack.c.bf16 %v57_v22, %v56_v21  ;;  %v40_v26 = vld [vmem:[#allocation2 + $0x30] sm:$0xff]  ;;  %v41_v27 = vld [vmem:[#allocation2 + $0x38] sm:$0xff] }
  0x1a   :  { %147 = vperm.xlu0 %287, %v143_v18   ;;  %v58_v28 = vld [vmem:[#allocation2 + $0xc0] sm:$0xff]  ;;  %v59_v29 = vld [vmem:[#allocation2 + $0xc8] sm:$0xff]  ;;  %v246_v30 = vpack.c.bf16 %v41_v27, %v40_v26  ;;  %v60_v34 = vld [vmem:[#allocation2 + $0xd0] sm:$0xff] }
  0x1b   :  { %v248_v31 = vpack.c.bf16 %v59_v29, %v58_v28  ;;  %v42_v32 = vld [vmem:[#allocation2 + $0x40] sm:$0xff]  ;;  %v43_v33 = vld [vmem:[#allocation2 + $0x48] sm:$0xff]  ;;  %v61_v35 = vld [vmem:[#allocation2 + $0xd8] sm:$0xff] }
  0x1c   :  { %v250_v36 = vpack.c.bf16 %v43_v33, %v42_v32  ;;  %v252_v37 = vpack.c.bf16 %v61_v35, %v60_v34  ;;  %v44_v38 = vld [vmem:[#allocation2 + $0x50] sm:$0xff]  ;;  %v45_v39 = vld [vmem:[#allocation2 + $0x58] sm:$0xff]  ;;  %v62_v40 = vld [vmem:[#allocation2 + $0xe0] sm:$0xff] }
  0x1d   :  { %v63_v41 = vld [vmem:[#allocation2 + $0xe8] sm:$0xff]  ;;  %v254_v42 = vpack.c.bf16 %v45_v39, %v44_v38  ;;  %v46_v44 = vld [vmem:[#allocation2 + $0x60] sm:$0xff]  ;;  %v64_v46 = vld [vmem:[#allocation2 + $0xf0] sm:$0xff] }
  0x1e   :  { %152 = vperm.xlu0 %287, %v144_v23   ;;  %v256_v43 = vpack.c.bf16 %v63_v41, %v62_v40  ;;  %v47_v45 = vld [vmem:[#allocation2 + $0x68] sm:$0xff]  ;;  %v65_v47 = vld [vmem:[#allocation2 + $0xf8] sm:$0xff]  ;;  %v48_v50 = vld [vmem:[#allocation2 + $0x70] sm:$0xff] }
  0x1f   :  { %239 = vmatpush3.bf16.xpose.msra.mxu0 %v238_v14  ;;  %273 = vmatpush3.bf16.xpose.msra.mxu1 %v238_v14  ;;  %v258_v48 = vpack.c.bf16 %v47_v45, %v46_v44  ;;  %v260_v49 = vpack.c.bf16 %v65_v47, %v64_v46  ;;  %v49_v51 = vld [vmem:[#allocation2 + $0x78] sm:$0xff]  ;;  %v159_v57 = vld [vmem:[%s418_s3] sm:$0x3]  ;;  %s310_s3 = scalar_lea.vmem %s185_s11, 512 }
  0x20   :  { %241 = vmatprep.subr.bf16.mxu0 %v240_v15  ;;  %266 = vmatprep.subr.bf16.mxu1 %v240_v15  ;;  %v262_v52 = vpack.c.bf16 %v49_v51, %v48_v50  ;;  %v164_v60 = vrot.slane %v159_v57, %v163_v56  ;;  %v168_v63 = vrot.slane %v159_v57, %v167_v58  ;;  %p311_p8 = scmp.ne.s32.totalorder %s185_s11, %s310_s3  ;;  %p316_p10 = scmp.lt.s32.totalorder %s310_s3, %s310_s3 }
  0x22   :  { %p317_p11 = por %p316_p10, %p315_p9 }
  0x24   :  { %p318_p12 = pnand %p317_p11, %p311_p8 }
  0x27   :  { %243 = vmatpush3.bf16.xpose.msra.mxu0 %v242_v24  ;;  %274 = vmatpush3.bf16.xpose.msra.mxu1 %v242_v24 }
  0x28   :  { %245 = vmatprep.subr.bf16.mxu0 %v244_v25  ;;  %267 = vmatprep.subr.bf16.mxu1 %v244_v25 }
  0x2f   :  { %247 = vmatpush3.bf16.xpose.msra.mxu0 %v246_v30  ;;  %275 = vmatpush3.bf16.xpose.msra.mxu1 %v246_v30 }
  0x30   :  { %249 = vmatprep.subr.bf16.mxu0 %v248_v31  ;;  %268 = vmatprep.subr.bf16.mxu1 %v248_v31 }
  0x37   :  { %251 = vmatpush3.bf16.xpose.msra.mxu0 %v250_v36  ;;  %276 = vmatpush3.bf16.xpose.msra.mxu1 %v250_v36 }
  0x38   :  { %253 = vmatprep.subr.bf16.mxu0 %v252_v37  ;;  %269 = vmatprep.subr.bf16.mxu1 %v252_v37 }
  0x3f   :  { %255 = vmatpush3.bf16.xpose.msra.mxu0 %v254_v42  ;;  %277 = vmatpush3.bf16.xpose.msra.mxu1 %v254_v42 }
  0x40   :  { %257 = vmatprep.subr.bf16.mxu0 %v256_v43  ;;  %270 = vmatprep.subr.bf16.mxu1 %v256_v43 }
  0x47   :  { %259 = vmatpush3.bf16.xpose.msra.mxu0 %v258_v48  ;;  %278 = vmatpush3.bf16.xpose.msra.mxu1 %v258_v48 }
  0x48   :  { %261 = vmatprep.subr.bf16.mxu0 %v260_v49  ;;  %271 = vmatprep.subr.bf16.mxu1 %v260_v49 }
  0x4f   :  { %263 = vmatpush3.bf16.xpose.msra.mxu0 %v262_v52  ;;  %279 = vmatpush3.bf16.xpose.msra.mxu1 %v262_v52 }
  0x56   :  { %229 = vmatmul.mubr.f32.vlgmr.msra.gmra.mrb[0].mxu0 %v383_v16  ;;  %231 = vmatmul.mubr.f32.vlgmr.msra.gmra.mrb[0].mxu1 %v389_v17 }
  0x99   :  { %v148_v55 = vpop.permute.xlu0 %147 }
  0x9d   :  { %v153_v59 = vpop.permute.xlu0 %152 }
 0x129   :  { %v132_v61 = vpop.f32.mrb[0].mxu0  ;;  %v138_v62 = vpop.f32.mrb[0].mxu1 }
 0x12a   :  { %v155_v0 = vmul.f32 %v148_v55, %v132_v61  ;;  %v157_v1 = vmul.f32 %v153_v59, %v138_v62  ;;  %v134_v2 = vpop.f32.mrb[1].mxu0  ;;  %v140_v3 = vpop.f32.mrb[1].mxu1 }
 0x12b   :  { %v156_v4 = vmul.f32 %v148_v55, %v134_v2  ;;  %v158_v5 = vmul.f32 %v153_v59, %v140_v3 }
 0x12c   :  { %v171_v6 = vmul.f32 %v164_v60, %v155_v0  ;;  %v173_v7 = vmul.f32 %v164_v60, %v157_v1 }
 0x12d   :  { %v172_v8 = vmul.f32 %v168_v63, %v156_v4  ;;  %v174_v9 = vmul.f32 %v168_v63, %v158_v5 }
 0x12e   :  { %175 = vst [vmem:[#allocation5] sm:$0xff] %v171_v6  ;;  %177 = vst [vmem:[#allocation5 + $0x10] sm:$0xff] %v173_v7 }
 0x12f   :  { %176 = vst [vmem:[#allocation5 + $0x8] sm:$0xff] %v172_v8  ;;  %178 = vst [vmem:[#allocation5 + $0x18] sm:$0xff] %v174_v9 }
 0x130   :  { %321 = shalt.err (!%p318_p12)
}
 0x131   :  { %s322_s14 = scalar_lea.hbm %s419_s4, 512 }
 0x132   :  { %p323_p13 = scmp.ne.s32.totalorder %s419_s4, %s322_s14  ;;  %p326_p0 = scmp.lt.u32.totalorder %s322_s14, %s419_s4 }
 0x134   :  { %p328_p1 = pnand %p326_p0, %p323_p13 }
 0x136   :  { %331 = shalt.err (!%p328_p1)
}
 0x137   :  { %s341_s19 = smov 256   ;;  %s342_s20 = smov 16  }
 0x138   :  { %190 = dma.vmem_to_hbm [thread:$0]  %s185_s11, 512, %s419_s4, [#allocation4], %s341_s19, %s341_s19, %s342_s20  }
 0x139   :  { %334 = dma.done.wait [#allocation4], 512  }
 0x13a   :  { %335 = vsyncadd [#allocation4], 4294966784 }
 0x13b   :  { %194 = vsyncpa [#allocation3], 1 }
 0x13c   :  { %195 = vsyncpa [#allocation4], 1 }

</bundles_post_ra>
